<compile_context>
chip_gen: v5e
topology: v5e:2x2
jax: 0.10.0
libtpu: 0.0.40
codegen_flags: <defaults>
</compile_context>

<pallas_src>
import functools

import jax
import jax.numpy as jnp
from jax.experimental import pallas as pl
from jax.experimental.pallas import tpu as pltpu


def _round_up(n, m):
    return ((n + m - 1) // m) * m


def _loss_kernel(x_ref, w_ref, b_ref, tgt_ref, bad_ref, alpha_ref, out_ref,
                 dwt_acc, db_acc, sg_acc, sb_acc, ng_acc, nb_acc,
                 *, n_rows, num_classes, num_bad):
    i = pl.program_id(0)

    @pl.when(i == 0)
    def _init():
        dwt_acc[...] = jnp.zeros_like(dwt_acc)
        db_acc[...] = jnp.zeros_like(db_acc)
        sg_acc[...] = jnp.zeros_like(sg_acc)
        sb_acc[...] = jnp.zeros_like(sb_acc)
        ng_acc[...] = jnp.zeros_like(ng_acc)
        nb_acc[...] = jnp.zeros_like(nb_acc)

    x = x_ref[...]                        # [TN, D]  fp32
    w = w_ref[...]                        # [D, CP]  fp32 (class-padded)
    bias = b_ref[...]                     # [1, CP]
    tgt = tgt_ref[...]                    # [TN, 1]  int32
    tn = x.shape[0]
    cp = w.shape[1]

    # --- masks built in-kernel (no dense one-hot / bad-mask from the host) ---
    row = jax.lax.broadcasted_iota(jnp.int32, (tn, 1), 0) + i * tn
    valid = (row < n_rows).astype(jnp.float32)              # padded rows -> 0

    bad_b = jnp.zeros((tn, 1), dtype=jnp.bool_)
    for k in range(num_bad):                                 # static unroll
        bad_b = jnp.logical_or(bad_b, tgt == bad_ref[0, k])  # SMEM scalar cmp
    bad = jnp.where(bad_b, 1.0, 0.0) * valid                 # [TN, 1]
    good = valid - bad                                       # [TN, 1]

    col = jax.lax.broadcasted_iota(jnp.int32, (tn, cp), 1)
    onehot = (col == tgt).astype(jnp.float32)                # [TN, CP]

    # --- linear model forward (MXU) ---
    logits = jnp.dot(x, w, preferred_element_type=jnp.float32) + bias
    logits = jnp.where(col < num_classes, logits, jnp.float32(-1e30))

    # --- stable softmax / CE without materializing log-softmax ---
    m = jnp.max(logits, axis=-1, keepdims=True)              # [TN, 1]
    e = jnp.exp(logits - m)                                   # padded cols -> 0
    s = jnp.sum(e, axis=-1, keepdims=True)                    # [TN, 1]
    p = e * pl.reciprocal(s, approx=True)                     # softmax (EUP rcp)
    tgt_logit = jnp.sum(onehot * logits, axis=-1, keepdims=True)
    ce = m + jnp.log(s) - tgt_logit                            # [TN, 1]

    sg_acc[...] += jnp.sum(ce * good)
    sb_acc[...] += jnp.sum(ce * bad)
    ng_acc[...] += jnp.sum(good)
    nb_acc[...] += jnp.sum(bad)

    # --- un-normalized bad-CE grad pieces (scaled by 1/n_bad at the end) ---
    dlog = (p - onehot) * bad                                  # [TN, CP]
    dwt_acc[...] += jax.lax.dot_general(                       # dlog^T @ x -> [CP, D]
        dlog, x, dimension_numbers=(((0,), (0,)), ((), ())),
        preferred_element_type=jnp.float32)
    db_acc[...] += jnp.sum(dlog, axis=0, keepdims=True)        # [1, CP]

    @pl.when(i == pl.num_programs(0) - 1)
    def _finalize():
        # NOTE: n_good == 0 or n_bad == 0 yields NaN/Inf, matching PyTorch CE
        # on an empty split (documented precondition: both splits non-empty).
        inv_good = 1.0 / ng_acc[...]                           # (1, 1)
        inv_bad = 1.0 / nb_acc[...]                            # (1, 1)
        good_ce = sg_acc[...] * inv_good
        bad_ce = sb_acc[...] * inv_bad
        gnorm_raw = (jnp.sum(dwt_acc[...] * dwt_acc[...])
                     + jnp.sum(db_acc[...] * db_acc[...]))
        gnorm = gnorm_raw * inv_bad * inv_bad
        alpha = alpha_ref[0, 0]                                # SMEM scalar
        out_ref[...] = good_ce + alpha * (gnorm - bad_ce)


def cross_entropy_with_gradient_penalty(x, W, b, targets, bad_labels, alpha,
                                        num_classes, *, tile_n=256):
    """Wrapper: pad / tile, then run the accumulating Pallas kernel."""
    x = jnp.asarray(x, jnp.float32)
    W = jnp.asarray(W, jnp.float32)
    b = jnp.asarray(b, jnp.float32).reshape(1, -1)
    targets = jnp.asarray(targets, jnp.int32)

    N, D = x.shape
    C = num_classes
    CP = _round_up(C, 128)                                 # lane-dense classes

    TN = min(_round_up(tile_n, 8), _round_up(N, 8))        # row tile
    N_pad = _round_up(N, TN)

    x_p = jnp.pad(x, ((0, N_pad - N), (0, 0)))
    w_p = jnp.pad(W, ((0, 0), (0, CP - C)))
    b_p = jnp.pad(b, ((0, 0), (0, CP - C)))
    tgt_p = jnp.pad(targets, (0, N_pad - N)).reshape(N_pad, 1)

    bad = jnp.asarray(bad_labels, jnp.int32).reshape(-1)
    if bad.size == 0:                                      # PyTorch default: empty
        bad = jnp.array([-1], dtype=jnp.int32)             # matches no target
    bad = bad.reshape(1, -1)
    alpha_arr = jnp.asarray(alpha, jnp.float32).reshape(1, 1)

    kernel = functools.partial(_loss_kernel, n_rows=N, num_classes=C,
                               num_bad=bad.shape[1])

    out = pl.pallas_call(
        kernel,
        out_shape=jax.ShapeDtypeStruct((1, 1), jnp.float32),
        grid=(N_pad // TN,),
        in_specs=[
            pl.BlockSpec((TN, D), lambda i: (i, 0)),       # x row tiles
            pl.BlockSpec((D, CP), lambda i: (0, 0)),       # W (resident block)
            pl.BlockSpec((1, CP), lambda i: (0, 0)),       # bias (resident)
            pl.BlockSpec((TN, 1), lambda i: (i, 0)),       # int32 targets
            pl.BlockSpec(memory_space=pltpu.MemorySpace.SMEM),  # bad labels
            pl.BlockSpec(memory_space=pltpu.MemorySpace.SMEM),  # alpha
        ],
        out_specs=pl.BlockSpec((1, 1), lambda i: (0, 0)),
        scratch_shapes=[
            pltpu.VMEM((CP, D), jnp.float32),  # dW^T accumulator
            pltpu.VMEM((1, CP), jnp.float32),  # db accumulator
            pltpu.VMEM((1, 1), jnp.float32),   # sum(ce * good)
            pltpu.VMEM((1, 1), jnp.float32),   # sum(ce * bad)
            pltpu.VMEM((1, 1), jnp.float32),   # n_good
            pltpu.VMEM((1, 1), jnp.float32),   # n_bad
        ],
        compiler_params=pltpu.CompilerParams(
            dimension_semantics=("arbitrary",)),
    )(x_p, w_p, b_p, tgt_p, bad, alpha_arr)
    return out[0, 0]


def _reference(x, W, b, targets, bad_labels, alpha, num_classes):
    """Pure-JAX reference mirroring the PyTorch semantics (uses jax.grad)."""
    onehot = jax.nn.one_hot(targets, num_classes, dtype=jnp.float32)
    bad = (targets[:, None] == bad_labels[None, :]).any(-1).astype(jnp.float32)
    good = 1.0 - bad

    def ce_masked(params, mask):
        Wp, bp = params
        logits = x @ Wp + bp
        logp = jax.nn.log_softmax(logits, axis=-1)
        ce = -jnp.sum(onehot * logp, axis=-1)
        return jnp.sum(ce * mask) / jnp.sum(mask)

    good_ce = ce_masked((W, b), good)
    bad_ce = ce_masked((W, b), bad)
    grads = jax.grad(ce_masked)((W, b), bad)
    gnorm = sum(jnp.sum(g * g) for g in grads)
    return good_ce + alpha * (gnorm - bad_ce)


if __name__ == "__main__":
    key = jax.random.PRNGKey(0)
    k1, k2, k3, k4 = jax.random.split(key, 4)

    N, D, C = 16, 32, 8                       # batch, features, classes
    alpha_schedule = [0.1, 0.2, 0.5]
    alpha = alpha_schedule[0]
    bad_labels = jnp.array([1, 3], dtype=jnp.int32)   # "bad concept" class ids

    x = jax.random.normal(k1, (N, D), dtype=jnp.float32)
    W = jax.random.normal(k2, (D, C), dtype=jnp.float32) * 0.1
    b = jax.random.normal(k3, (C,), dtype=jnp.float32) * 0.01
    targets = jax.random.randint(k4, (N,), 0, C, dtype=jnp.int32)
    # guarantee both splits are non-empty (CE on an empty split is NaN)
    targets = targets.at[0].set(1).at[1].set(0)

    # tile_n=8 -> grid of 2 row tiles, exercising the cross-step accumulators.
    loss = cross_entropy_with_gradient_penalty(x, W, b, targets, bad_labels,
                                               alpha, C, tile_n=8)
    loss = jax.block_until_ready(loss)

    ref = _reference(x, W, b, targets, bad_labels, alpha, C)
    assert jnp.isfinite(loss), "kernel produced non-finite loss"
    assert jnp.allclose(loss, ref, rtol=2e-3, atol=1e-4), (loss, ref)
    print("KERNEL_OK")
</pallas_src>

<mosaic_0001>
module attributes {stable_mosaic.version = 11 : i64} {
  func.func @_loss_kernel(%arg0: i32, %arg1: memref<8x32xf32, #tpu.memory_space<vmem>>, %arg2: memref<32x128xf32, #tpu.memory_space<vmem>>, %arg3: memref<1x128xf32, #tpu.memory_space<vmem>>, %arg4: memref<8x1xi32, #tpu.memory_space<vmem>>, %arg5: memref<1x2xi32, #tpu.memory_space<smem>>, %arg6: memref<1x1xf32, #tpu.memory_space<smem>>, %arg7: memref<1x1xf32, #tpu.memory_space<vmem>>, %arg8: memref<128x32xf32, #tpu.memory_space<vmem>>, %arg9: memref<1x128xf32, #tpu.memory_space<vmem>>, %arg10: memref<1x1xf32, #tpu.memory_space<vmem>>, %arg11: memref<1x1xf32, #tpu.memory_space<vmem>>, %arg12: memref<1x1xf32, #tpu.memory_space<vmem>>, %arg13: memref<1x1xf32, #tpu.memory_space<vmem>>) attributes {dimension_semantics = [#tpu.dimension_semantics<arbitrary>], iteration_bounds = array<i64: 2>, scalar_prefetch = 0 : i64, scratch_operands = 6 : i64, tpu.core_type = #tpu.core_type<tc>, window_params = [{transform_indices = @transform_0, window_bounds = array<i64: 8, 32>}, {pipeline_mode = #tpu.pipeline_mode<synchronous>, transform_indices = @transform_1, window_bounds = array<i64: 32, 128>}, {pipeline_mode = #tpu.pipeline_mode<synchronous>, transform_indices = @transform_2, window_bounds = array<i64: 1, 128>}, {transform_indices = @transform_3, window_bounds = array<i64: 8, 1>}, {transform_indices = @transform_4, window_bounds = array<i64: 1, 2>}, {transform_indices = @transform_5, window_bounds = array<i64: 1, 1>}, {pipeline_mode = #tpu.pipeline_mode<synchronous>, transform_indices = @transform_6, window_bounds = array<i64: 1, 1>}]} {
    %c0_i32 = arith.constant 0 : i32
    %0 = arith.cmpi eq, %arg0, %c0_i32 : i32
    %1 = arith.extui %0 : i1 to i32
    %c0_i32_0 = arith.constant 0 : i32
    %2 = arith.cmpi ne, %1, %c0_i32_0 : i32
    scf.if %2 {
      %cst_49 = arith.constant 0.000000e+00 : f32
      %106 = vector.broadcast %cst_49 : f32 to vector<128x32xf32>
      %c0_50 = arith.constant 0 : index
      %c0_51 = arith.constant 0 : index
      %107 = vector.load %arg8[%c0_50, %c0_51] : memref<128x32xf32, #tpu.memory_space<vmem>>, vector<128x32xf32>
      tpu.vector_store %arg8[%c0_50, %c0_51], %106 {strides = array<i32>} : memref<128x32xf32, #tpu.memory_space<vmem>>, vector<128x32xf32>,
      %cst_52 = arith.constant 0.000000e+00 : f32
      %108 = vector.broadcast %cst_52 : f32 to vector<1x128xf32>
      %c0_53 = arith.constant 0 : index
      %c0_54 = arith.constant 0 : index
      %109 = vector.load %arg9[%c0_53, %c0_54] : memref<1x128xf32, #tpu.memory_space<vmem>>, vector<1x128xf32>
      tpu.vector_store %arg9[%c0_53, %c0_54], %108 {strides = array<i32>} : memref<1x128xf32, #tpu.memory_space<vmem>>, vector<1x128xf32>,
      %cst_55 = arith.constant 0.000000e+00 : f32
      %110 = vector.broadcast %cst_55 : f32 to vector<1x1xf32>
      %c0_56 = arith.constant 0 : index
      %c0_57 = arith.constant 0 : index
      %111 = vector.load %arg10[%c0_56, %c0_57] : memref<1x1xf32, #tpu.memory_space<vmem>>, vector<1x1xf32>
      tpu.vector_store %arg10[%c0_56, %c0_57], %110 {strides = array<i32>} : memref<1x1xf32, #tpu.memory_space<vmem>>, vector<1x1xf32>,
      %cst_58 = arith.constant 0.000000e+00 : f32
      %112 = vector.broadcast %cst_58 : f32 to vector<1x1xf32>
      %c0_59 = arith.constant 0 : index
      %c0_60 = arith.constant 0 : index
      %113 = vector.load %arg11[%c0_59, %c0_60] : memref<1x1xf32, #tpu.memory_space<vmem>>, vector<1x1xf32>
      tpu.vector_store %arg11[%c0_59, %c0_60], %112 {strides = array<i32>} : memref<1x1xf32, #tpu.memory_space<vmem>>, vector<1x1xf32>,
      %cst_61 = arith.constant 0.000000e+00 : f32
      %114 = vector.broadcast %cst_61 : f32 to vector<1x1xf32>
      %c0_62 = arith.constant 0 : index
      %c0_63 = arith.constant 0 : index
      %115 = vector.load %arg12[%c0_62, %c0_63] : memref<1x1xf32, #tpu.memory_space<vmem>>, vector<1x1xf32>
      tpu.vector_store %arg12[%c0_62, %c0_63], %114 {strides = array<i32>} : memref<1x1xf32, #tpu.memory_space<vmem>>, vector<1x1xf32>,
      %cst_64 = arith.constant 0.000000e+00 : f32
      %116 = vector.broadcast %cst_64 : f32 to vector<1x1xf32>
      %c0_65 = arith.constant 0 : index
      %c0_66 = arith.constant 0 : index
      %117 = vector.load %arg13[%c0_65, %c0_66] : memref<1x1xf32, #tpu.memory_space<vmem>>, vector<1x1xf32>
      tpu.vector_store %arg13[%c0_65, %c0_66], %116 {strides = array<i32>} : memref<1x1xf32, #tpu.memory_space<vmem>>, vector<1x1xf32>,
    } else {
    }
    %c0 = arith.constant 0 : index
    %c0_1 = arith.constant 0 : index
    %3 = vector.load %arg1[%c0, %c0_1] : memref<8x32xf32, #tpu.memory_space<vmem>>, vector<8x32xf32>
    %c0_2 = arith.constant 0 : index
    %c0_3 = arith.constant 0 : index
    %4 = vector.load %arg2[%c0_2, %c0_3] : memref<32x128xf32, #tpu.memory_space<vmem>>, vector<32x128xf32>
    %c0_4 = arith.constant 0 : index
    %c0_5 = arith.constant 0 : index
    %5 = vector.load %arg3[%c0_4, %c0_5] : memref<1x128xf32, #tpu.memory_space<vmem>>, vector<1x128xf32>
    %c0_6 = arith.constant 0 : index
    %c0_7 = arith.constant 0 : index
    %6 = vector.load %arg4[%c0_6, %c0_7] : memref<8x1xi32, #tpu.memory_space<vmem>>, vector<8x1xi32>
    %7 = tpu.iota {dimensions = array<i32: 0>} : vector<8x1xi32>
    %c8_i32 = arith.constant 8 : i32
    %8 = arith.muli %arg0, %c8_i32 : i32
    %9 = vector.broadcast %8 : i32 to vector<8x1xi32>
    %10 = arith.addi %7, %9 : vector<8x1xi32>
    %c16_i32 = arith.constant 16 : i32
    %11 = vector.broadcast %c16_i32 : i32 to vector<8x1xi32>
    %12 = arith.cmpi slt, %10, %11 : vector<8x1xi32>
    %13 = arith.extui %12 : vector<8x1xi1> to vector<8x1xi32>
    %14 = arith.sitofp %13 : vector<8x1xi32> to vector<8x1xf32>
    %false = arith.constant false
    %15 = vector.broadcast %false : i1 to vector<8x1xi1>
    %c0_8 = arith.constant 0 : index
    %c0_9 = arith.constant 0 : index
    %16 = memref.load %arg5[%c0_8, %c0_9] : memref<1x2xi32, #tpu.memory_space<smem>>
    %17 = vector.broadcast %16 : i32 to vector<8x1xi32>
    %18 = arith.cmpi eq, %6, %17 : vector<8x1xi32>
    %19 = arith.ori %15, %18 : vector<8x1xi1>
    %c0_10 = arith.constant 0 : index
    %c1 = arith.constant 1 : index
    %20 = memref.load %arg5[%c0_10, %c1] : memref<1x2xi32, #tpu.memory_space<smem>>
    %21 = vector.broadcast %20 : i32 to vector<8x1xi32>
    %22 = arith.cmpi eq, %6, %21 : vector<8x1xi32>
    %23 = arith.ori %19, %22 : vector<8x1xi1>
    %cst = arith.constant 1.000000e+00 : f32
    %cst_11 = arith.constant 0.000000e+00 : f32
    %24 = vector.broadcast %cst : f32 to vector<8x1xf32>
    %25 = vector.broadcast %cst_11 : f32 to vector<8x1xf32>
    %26 = arith.select %23, %24, %25 : vector<8x1xi1>, vector<8x1xf32>
    %27 = arith.mulf %26, %14 : vector<8x1xf32>
    %28 = arith.subf %14, %27 : vector<8x1xf32>
    %29 = tpu.iota {dimensions = array<i32: 1>} : vector<8x128xi32>
    %30 = vector.broadcast %6 : vector<8x1xi32> to vector<8x128xi32>
    %31 = arith.cmpi eq, %29, %30 : vector<8x128xi32>
    %32 = arith.extui %31 : vector<8x128xi1> to vector<8x128xi32>
    %33 = arith.sitofp %32 : vector<8x128xi32> to vector<8x128xf32>
    %cst_12 = arith.constant dense<0.000000e+00> : vector<8x128xf32>
    %34 = tpu.matmul %3, %4, %cst_12 {dimension_numbers = #tpu.dot_dimension_numbers<[1], [0], [0], [1], [0, 0, 1, 1], [], []>} : vector<8x32xf32>, vector<32x128xf32>, vector<8x128xf32> -> vector<8x128xf32>
    %35 = vector.broadcast %5 : vector<1x128xf32> to vector<8x128xf32>
    %36 = arith.addf %34, %35 : vector<8x128xf32>
    %c8_i32_13 = arith.constant 8 : i32
    %37 = vector.broadcast %c8_i32_13 : i32 to vector<8x128xi32>
    %38 = arith.cmpi slt, %29, %37 : vector<8x128xi32>
    %cst_14 = arith.constant -1.000000e+30 : f32
    %39 = vector.broadcast %cst_14 : f32 to vector<8x128xf32>
    %40 = arith.select %38, %36, %39 : vector<8x128xi1>, vector<8x128xf32>
    %cst_15 = arith.constant dense<0xFF800000> : vector<8xf32>
    %41 = vector.multi_reduction <maximumf>, %40, %cst_15 [1] : vector<8x128xf32> to vector<8xf32>
    %42 = vector.shape_cast %41 : vector<8xf32> to vector<8x1xf32>
    %43 = vector.broadcast %42 : vector<8x1xf32> to vector<8x128xf32>
    %44 = arith.subf %40, %43 : vector<8x128xf32>
    %45 = math.exp %44 : vector<8x128xf32>
    %cst_16 = arith.constant dense<0.000000e+00> : vector<8xf32>
    %46 = vector.multi_reduction <add>, %45, %cst_16 [1] : vector<8x128xf32> to vector<8xf32>
    %47 = vector.shape_cast %46 : vector<8xf32> to vector<8x1xf32>
    %48 = tpu.reciprocal %47 {approx = true} : vector<8x1xf32> -> vector<8x1xf32>
    %49 = vector.broadcast %48 : vector<8x1xf32> to vector<8x128xf32>
    %50 = arith.mulf %45, %49 : vector<8x128xf32>
    %51 = arith.mulf %33, %40 : vector<8x128xf32>
    %cst_17 = arith.constant dense<0.000000e+00> : vector<8xf32>
    %52 = vector.multi_reduction <add>, %51, %cst_17 [1] : vector<8x128xf32> to vector<8xf32>
    %53 = vector.shape_cast %52 : vector<8xf32> to vector<8x1xf32>
    %54 = math.log %47 : vector<8x1xf32>
    %55 = arith.addf %42, %54 : vector<8x1xf32>
    %56 = arith.subf %55, %53 : vector<8x1xf32>
    %c0_18 = arith.constant 0 : index
    %c0_19 = arith.constant 0 : index
    %57 = vector.load %arg10[%c0_18, %c0_19] : memref<1x1xf32, #tpu.memory_space<vmem>>, vector<1x1xf32>
    %58 = arith.mulf %56, %28 : vector<8x1xf32>
    %59 = vector.shape_cast %58 : vector<8x1xf32> to vector<1x8x1xf32>
    %cst_20 = arith.constant dense<0.000000e+00> : vector<1xf32>
    %60 = vector.multi_reduction <add>, %59, %cst_20 [1, 2] : vector<1x8x1xf32> to vector<1xf32>
    %61 = vector.shape_cast %60 : vector<1xf32> to vector<1x1x1xf32>
    %62 = vector.extract %61[0, 0, 0] : f32 from vector<1x1x1xf32>
    %63 = vector.broadcast %62 : f32 to vector<1x1xf32>
    %64 = arith.addf %57, %63 : vector<1x1xf32>
    %c0_21 = arith.constant 0 : index
    %c0_22 = arith.constant 0 : index
    %65 = vector.load %arg10[%c0_21, %c0_22] : memref<1x1xf32, #tpu.memory_space<vmem>>, vector<1x1xf32>
    tpu.vector_store %arg10[%c0_21, %c0_22], %64 {strides = array<i32>} : memref<1x1xf32, #tpu.memory_space<vmem>>, vector<1x1xf32>,
    %c0_23 = arith.constant 0 : index
    %c0_24 = arith.constant 0 : index
    %66 = vector.load %arg11[%c0_23, %c0_24] : memref<1x1xf32, #tpu.memory_space<vmem>>, vector<1x1xf32>
    %67 = arith.mulf %56, %27 : vector<8x1xf32>
    %68 = vector.shape_cast %67 : vector<8x1xf32> to vector<1x8x1xf32>
    %cst_25 = arith.constant dense<0.000000e+00> : vector<1xf32>
    %69 = vector.multi_reduction <add>, %68, %cst_25 [1, 2] : vector<1x8x1xf32> to vector<1xf32>
    %70 = vector.shape_cast %69 : vector<1xf32> to vector<1x1x1xf32>
    %71 = vector.extract %70[0, 0, 0] : f32 from vector<1x1x1xf32>
    %72 = vector.broadcast %71 : f32 to vector<1x1xf32>
    %73 = arith.addf %66, %72 : vector<1x1xf32>
    %c0_26 = arith.constant 0 : index
    %c0_27 = arith.constant 0 : index
    %74 = vector.load %arg11[%c0_26, %c0_27] : memref<1x1xf32, #tpu.memory_space<vmem>>, vector<1x1xf32>
    tpu.vector_store %arg11[%c0_26, %c0_27], %73 {strides = array<i32>} : memref<1x1xf32, #tpu.memory_space<vmem>>, vector<1x1xf32>,
    %c0_28 = arith.constant 0 : index
    %c0_29 = arith.constant 0 : index
    %75 = vector.load %arg12[%c0_28, %c0_29] : memref<1x1xf32, #tpu.memory_space<vmem>>, vector<1x1xf32>
    %76 = vector.shape_cast %28 : vector<8x1xf32> to vector<1x8x1xf32>
    %cst_30 = arith.constant dense<0.000000e+00> : vector<1xf32>
    %77 = vector.multi_reduction <add>, %76, %cst_30 [1, 2] : vector<1x8x1xf32> to vector<1xf32>
    %78 = vector.shape_cast %77 : vector<1xf32> to vector<1x1x1xf32>
    %79 = vector.extract %78[0, 0, 0] : f32 from vector<1x1x1xf32>
    %80 = vector.broadcast %79 : f32 to vector<1x1xf32>
    %81 = arith.addf %75, %80 : vector<1x1xf32>
    %c0_31 = arith.constant 0 : index
    %c0_32 = arith.constant 0 : index
    %82 = vector.load %arg12[%c0_31, %c0_32] : memref<1x1xf32, #tpu.memory_space<vmem>>, vector<1x1xf32>
    tpu.vector_store %arg12[%c0_31, %c0_32], %81 {strides = array<i32>} : memref<1x1xf32, #tpu.memory_space<vmem>>, vector<1x1xf32>,
    %c0_33 = arith.constant 0 : index
    %c0_34 = arith.constant 0 : index
    %83 = vector.load %arg13[%c0_33, %c0_34] : memref<1x1xf32, #tpu.memory_space<vmem>>, vector<1x1xf32>
    %84 = vector.shape_cast %27 : vector<8x1xf32> to vector<1x8x1xf32>
    %cst_35 = arith.constant dense<0.000000e+00> : vector<1xf32>
    %85 = vector.multi_reduction <add>, %84, %cst_35 [1, 2] : vector<1x8x1xf32> to vector<1xf32>
    %86 = vector.shape_cast %85 : vector<1xf32> to vector<1x1x1xf32>
    %87 = vector.extract %86[0, 0, 0] : f32 from vector<1x1x1xf32>
    %88 = vector.broadcast %87 : f32 to vector<1x1xf32>
    %89 = arith.addf %83, %88 : vector<1x1xf32>
    %c0_36 = arith.constant 0 : index
    %c0_37 = arith.constant 0 : index
    %90 = vector.load %arg13[%c0_36, %c0_37] : memref<1x1xf32, #tpu.memory_space<vmem>>, vector<1x1xf32>
    tpu.vector_store %arg13[%c0_36, %c0_37], %89 {strides = array<i32>} : memref<1x1xf32, #tpu.memory_space<vmem>>, vector<1x1xf32>,
    %91 = arith.subf %50, %33 : vector<8x128xf32>
    %92 = vector.broadcast %27 : vector<8x1xf32> to vector<8x128xf32>
    %93 = arith.mulf %91, %92 : vector<8x128xf32>
    %c0_38 = arith.constant 0 : index
    %c0_39 = arith.constant 0 : index
    %94 = vector.load %arg8[%c0_38, %c0_39] : memref<128x32xf32, #tpu.memory_space<vmem>>, vector<128x32xf32>
    %cst_40 = arith.constant dense<0.000000e+00> : vector<128x32xf32>
    %95 = tpu.matmul %93, %3, %cst_40 {dimension_numbers = #tpu.dot_dimension_numbers<[0], [0], [1], [1], [0, 1, 1, 1], [], []>} : vector<8x128xf32>, vector<8x32xf32>, vector<128x32xf32> -> vector<128x32xf32>
    %96 = arith.addf %94, %95 : vector<128x32xf32>
    %c0_41 = arith.constant 0 : index
    %c0_42 = arith.constant 0 : index
    %97 = vector.load %arg8[%c0_41, %c0_42] : memref<128x32xf32, #tpu.memory_space<vmem>>, vector<128x32xf32>
    tpu.vector_store %arg8[%c0_41, %c0_42], %96 {strides = array<i32>} : memref<128x32xf32, #tpu.memory_space<vmem>>, vector<128x32xf32>,
    %c0_43 = arith.constant 0 : index
    %c0_44 = arith.constant 0 : index
    %98 = vector.load %arg9[%c0_43, %c0_44] : memref<1x128xf32, #tpu.memory_space<vmem>>, vector<1x128xf32>
    %cst_45 = arith.constant dense<0.000000e+00> : vector<128xf32>
    %99 = vector.multi_reduction <add>, %93, %cst_45 [0] : vector<8x128xf32> to vector<128xf32>
    %100 = vector.shape_cast %99 : vector<128xf32> to vector<1x128xf32>
    %101 = arith.addf %98, %100 : vector<1x128xf32>
    %c0_46 = arith.constant 0 : index
    %c0_47 = arith.constant 0 : index
    %102 = vector.load %arg9[%c0_46, %c0_47] : memref<1x128xf32, #tpu.memory_space<vmem>>, vector<1x128xf32>
    tpu.vector_store %arg9[%c0_46, %c0_47], %101 {strides = array<i32>} : memref<1x128xf32, #tpu.memory_space<vmem>>, vector<1x128xf32>,
    %c1_i32 = arith.constant 1 : i32
    %103 = arith.cmpi eq, %arg0, %c1_i32 : i32
    %104 = arith.extui %103 : i1 to i32
    %c0_i32_48 = arith.constant 0 : i32
    %105 = arith.cmpi ne, %104, %c0_i32_48 : i32
    scf.if %105 {
      %c0_49 = arith.constant 0 : index
      %c0_50 = arith.constant 0 : index
      %106 = vector.load %arg12[%c0_49, %c0_50] : memref<1x1xf32, #tpu.memory_space<vmem>>, vector<1x1xf32>
      %cst_51 = arith.constant 1.000000e+00 : f32
      %107 = vector.broadcast %cst_51 : f32 to vector<1x1xf32>
      %108 = arith.divf %107, %106 : vector<1x1xf32>
      %c0_52 = arith.constant 0 : index
      %c0_53 = arith.constant 0 : index
      %109 = vector.load %arg13[%c0_52, %c0_53] : memref<1x1xf32, #tpu.memory_space<vmem>>, vector<1x1xf32>
      %cst_54 = arith.constant 1.000000e+00 : f32
      %110 = vector.broadcast %cst_54 : f32 to vector<1x1xf32>
      %111 = arith.divf %110, %109 : vector<1x1xf32>
      %c0_55 = arith.constant 0 : index
      %c0_56 = arith.constant 0 : index
      %112 = vector.load %arg10[%c0_55, %c0_56] : memref<1x1xf32, #tpu.memory_space<vmem>>, vector<1x1xf32>
      %113 = arith.mulf %112, %108 : vector<1x1xf32>
      %c0_57 = arith.constant 0 : index
      %c0_58 = arith.constant 0 : index
      %114 = vector.load %arg11[%c0_57, %c0_58] : memref<1x1xf32, #tpu.memory_space<vmem>>, vector<1x1xf32>
      %115 = arith.mulf %114, %111 : vector<1x1xf32>
      %c0_59 = arith.constant 0 : index
      %c0_60 = arith.constant 0 : index
      %116 = vector.load %arg8[%c0_59, %c0_60] : memref<128x32xf32, #tpu.memory_space<vmem>>, vector<128x32xf32>
      %c0_61 = arith.constant 0 : index
      %c0_62 = arith.constant 0 : index
      %117 = vector.load %arg8[%c0_61, %c0_62] : memref<128x32xf32, #tpu.memory_space<vmem>>, vector<128x32xf32>
      %118 = arith.mulf %116, %117 : vector<128x32xf32>
      %119 = vector.shape_cast %118 : vector<128x32xf32> to vector<1x128x32xf32>
      %cst_63 = arith.constant dense<0.000000e+00> : vector<1xf32>
      %120 = vector.multi_reduction <add>, %119, %cst_63 [1, 2] : vector<1x128x32xf32> to vector<1xf32>
      %121 = vector.shape_cast %120 : vector<1xf32> to vector<1x1x1xf32>
      %122 = vector.extract %121[0, 0, 0] : f32 from vector<1x1x1xf32>
      %c0_64 = arith.constant 0 : index
      %c0_65 = arith.constant 0 : index
      %123 = vector.load %arg9[%c0_64, %c0_65] : memref<1x128xf32, #tpu.memory_space<vmem>>, vector<1x128xf32>
      %c0_66 = arith.constant 0 : index
      %c0_67 = arith.constant 0 : index
      %124 = vector.load %arg9[%c0_66, %c0_67] : memref<1x128xf32, #tpu.memory_space<vmem>>, vector<1x128xf32>
      %125 = arith.mulf %123, %124 : vector<1x128xf32>
      %126 = vector.shape_cast %125 : vector<1x128xf32> to vector<1x1x128xf32>
      %cst_68 = arith.constant dense<0.000000e+00> : vector<1xf32>
      %127 = vector.multi_reduction <add>, %126, %cst_68 [1, 2] : vector<1x1x128xf32> to vector<1xf32>
      %128 = vector.shape_cast %127 : vector<1xf32> to vector<1x1x1xf32>
      %129 = vector.extract %128[0, 0, 0] : f32 from vector<1x1x1xf32>
      %130 = arith.addf %122, %129 : f32
      %131 = vector.broadcast %130 : f32 to vector<1x1xf32>
      %132 = arith.mulf %131, %111 : vector<1x1xf32>
      %133 = arith.mulf %132, %111 : vector<1x1xf32>
      %c0_69 = arith.constant 0 : index
      %c0_70 = arith.constant 0 : index
      %134 = memref.load %arg6[%c0_69, %c0_70] : memref<1x1xf32, #tpu.memory_space<smem>>
      %135 = arith.subf %133, %115 : vector<1x1xf32>
      %136 = vector.broadcast %134 : f32 to vector<1x1xf32>
      %137 = arith.mulf %136, %135 : vector<1x1xf32>
      %138 = arith.addf %113, %137 : vector<1x1xf32>
      %c0_71 = arith.constant 0 : index
      %c0_72 = arith.constant 0 : index
      %139 = vector.load %arg7[%c0_71, %c0_72] : memref<1x1xf32, #tpu.memory_space<vmem>>, vector<1x1xf32>
      tpu.vector_store %arg7[%c0_71, %c0_72], %138 {strides = array<i32>} : memref<1x1xf32, #tpu.memory_space<vmem>>, vector<1x1xf32>,
    } else {
    }
    return
  }
  func.func @transform_0(%arg0: i32) -> (i32, i32) {
    %c0_i32 = arith.constant 0 : i32
    %c0_i32_0 = arith.constant 0 : i32
    return %arg0, %c0_i32 : i32, i32
  }
  func.func @transform_1(%arg0: i32) -> (i32, i32) {
    %c0_i32 = arith.constant 0 : i32
    %c0_i32_0 = arith.constant 0 : i32
    %c0_i32_1 = arith.constant 0 : i32
    return %c0_i32, %c0_i32_0 : i32, i32
  }
  func.func @transform_2(%arg0: i32) -> (i32, i32) {
    %c0_i32 = arith.constant 0 : i32
    %c0_i32_0 = arith.constant 0 : i32
    %c0_i32_1 = arith.constant 0 : i32
    return %c0_i32, %c0_i32_0 : i32, i32
  }
  func.func @transform_3(%arg0: i32) -> (i32, i32) {
    %c0_i32 = arith.constant 0 : i32
    %c0_i32_0 = arith.constant 0 : i32
    return %arg0, %c0_i32 : i32, i32
  }
  func.func @transform_4(%arg0: i32) -> (i32, i32) {
    %c0_i32 = arith.constant 0 : i32
    %c0_i32_0 = arith.constant 0 : i32
    %c0_i32_1 = arith.constant 0 : i32
    return %c0_i32, %c0_i32_0 : i32, i32
  }
  func.func @transform_5(%arg0: i32) -> (i32, i32) {
    %c0_i32 = arith.constant 0 : i32
    %c0_i32_0 = arith.constant 0 : i32
    %c0_i32_1 = arith.constant 0 : i32
    return %c0_i32, %c0_i32_0 : i32, i32
  }
  func.func @transform_6(%arg0: i32) -> (i32, i32) {
    %c0_i32 = arith.constant 0 : i32
    %c0_i32_0 = arith.constant 0 : i32
    %c0_i32_1 = arith.constant 0 : i32
    return %c0_i32, %c0_i32_0 : i32, i32
  }
}

</mosaic_0001>

<bundles_post_ra>
// kernel: tpu_custom_call.1
= control target key start
LH: loop header
LB: loop body
LE: loop exit
PB: predicated region body
PF: predicated region fallthrough
CT: control target
= control target key end

     0   :  { %s1275_s0 = inlined_call_operand.vmem [shape: f32[16,32], index: 0, kind: input, shape index: {}]   ;;  %s1276_s1 = inlined_call_operand.hbm [shape: f32[32,128], index: 1, kind: input, shape index: {}]   ;;  %s1277_s2 = inlined_call_operand.vmem [shape: f32[1,128], index: 2, kind: input, shape index: {}]   ;;  %s1278_s3 = inlined_call_operand.vmem [shape: s32[16,1], index: 3, kind: input, shape index: {}]   ;;  %s1279_s4 = inlined_call_operand.vmem [shape: s32[1,2], index: 4, kind: input, shape index: {}]   ;;  %s1280_s5 = inlined_call_operand.<no memory space> [shape: f32[1,1], index: 5, kind: input, shape index: {}]   ;;  %s1281_s6 = inlined_call_operand.hbm [shape: f32[1,1], index: 6, kind: output, shape index: {}]  }
   0x1   :  { %11 = sst [smem:[#allocation8]] %s1280_s5 }
   0x2   :  { %12 = vsyncpa [#allocation10], 0 }
   0x3   :  { %13 = vsyncpa [#allocation12], 0 }
   0x4   :  { %14 = vsyncpa [#allocation11], 0  ;;  %s1123_s23 = smov 0  }
   0x5 LB: > { %s193_s26 = sshll.u32 %s1276_s1, 4  ;;  %s1132_s27 = sadd.s32 4294967295, %s1075_s23   ;;  %s1075_s23 = sphi %s1123_s23, %s20_s23   ;;  %s194_s26 = int_to_ptr.hbm [resolvable:$true] %s193_s26 }
   0x6   : > { %p879_p0 = scmp.ge.s32.totalorder %s1075_s23, 1  ;;  %p182_p1 = scmp.lt.s32.totalorder %s1075_s23, 3 }
   0x7   : > { %p880_p2 = scmp.ne.s32.totalorder %s1132_s27, 0  ;;  %p949_p3 = scmp.eq.s32.totalorder %s1132_s27, 0 }
   0x8   : > { %p1138_p4 = pnand %p879_p0, %p182_p1  ;;  %s1077_s28 = smov [#allocation9]  }
   0x9   : > { %s195_s29 = sshll.u32 %s1077_s28, 4  ;;  %s211_s8 = sshll.u32 %s1279_s4, 4  ;;  %s196_s29 = int_to_ptr.vmem [resolvable:$true] %s195_s29  ;;  %s212_s8 = int_to_ptr.vmem [resolvable:$true] %s211_s8 }
   0xa   : > { %p942_p5 = pneg %p1138_p4  ;;  %s1078_s9 = smov 128  }
   0xb   : > { %s1079_s10 = smov 8   ;;  %s1080_s11 = smov [#allocation13]  }
   0xc   : > { %p943_p6 = pnand %p949_p3, %p942_p5  ;;  %241 = sbr.rel (%p1138_p4) target bundleno = 1234 (0x4d2), region = 44 }
   0xe   : > { %945 = dma.hbm_to_vmem [thread:$0]  (!%p943_p6), %s194_s26, 512, %s196_s29, [#allocation10], %s1078_s9, %s1078_s9, %s1079_s10  }
   0xf   : > { %948 = dma.vmem_to_smem (!%p943_p6), %s212_s8, 16, %s1080_s11, [#allocation12]  }
  0x11   : > { %1062 = dma.done.wait (%p949_p3), [#allocation10], 512  }
  0x12   : > { %1064 = vsyncadd (%p949_p3), [#allocation10], 4294966784 }
  0x13   : > { %1066 = dma.done.wait (%p949_p3), [#allocation12], 16  }
  0x14   : > { %1068 = vsyncadd (%p949_p3), [#allocation12], 4294967280 }
  0x15   : > { %253 = sfence }
  0x16   : > { %p276_p7 = scmp.lt.s32.totalorder %s1132_s27, 1 }
  0x17   : > { %287 = sbr.rel (%p880_p2) target bundleno = 50 (0x32), region = 56 }
  0x18   : > { %s277_s12 = scalar_select %p276_p7, %s1132_s27, 1 }
  0x1a   : > { %s886_s13 = sshll.u32 %s277_s12, 3 }
  0x1b   : > { %s1164_s16 = scalar_lea.vmem %s1275_s0, %s886_s13  ;;  %s1169_s19 = scalar_lea.vmem %s1278_s3, %s886_s13 }
  0x1c   : > { %vm288_vm0 = vcmask 261120   ;;  %v1081_v0 = vmov 0.0   ;;  %vm306_vm1 = vcmask 0  }
  0x1d   : > { %289 = vst.msk [vmem:[#allocation2] sm:$0xff] %vm288_vm0, %v1081_v0 }
  0x1e   : > { %290 = vst.msk [vmem:[#allocation2 + $0x8] sm:$0xff] %vm288_vm0, %v1081_v0 }
  0x1f   : > { %291 = vst.msk [vmem:[#allocation2 + $0x10] sm:$0xff] %vm288_vm0, %v1081_v0 }
  0x20   : > { %292 = vst.msk [vmem:[#allocation2 + $0x18] sm:$0xff] %vm288_vm0, %v1081_v0 }
  0x21   : > { %293 = vst.msk [vmem:[#allocation2 + $0x20] sm:$0xff] %vm288_vm0, %v1081_v0 }
  0x22   : > { %294 = vst.msk [vmem:[#allocation2 + $0x28] sm:$0xff] %vm288_vm0, %v1081_v0 }
  0x23   : > { %295 = vst.msk [vmem:[#allocation2 + $0x30] sm:$0xff] %vm288_vm0, %v1081_v0 }
  0x24   : > { %296 = vst.msk [vmem:[#allocation2 + $0x38] sm:$0xff] %vm288_vm0, %v1081_v0 }
  0x25   : > { %297 = vst.msk [vmem:[#allocation2 + $0x40] sm:$0xff] %vm288_vm0, %v1081_v0 }
  0x26   : > { %298 = vst.msk [vmem:[#allocation2 + $0x48] sm:$0xff] %vm288_vm0, %v1081_v0 }
  0x27   : > { %299 = vst.msk [vmem:[#allocation2 + $0x50] sm:$0xff] %vm288_vm0, %v1081_v0 }
  0x28   : > { %300 = vst.msk [vmem:[#allocation2 + $0x58] sm:$0xff] %vm288_vm0, %v1081_v0 }
  0x29   : > { %301 = vst.msk [vmem:[#allocation2 + $0x60] sm:$0xff] %vm288_vm0, %v1081_v0 }
  0x2a   : > { %302 = vst.msk [vmem:[#allocation2 + $0x68] sm:$0xff] %vm288_vm0, %v1081_v0 }
  0x2b   : > { %303 = vst.msk [vmem:[#allocation2 + $0x70] sm:$0xff] %vm288_vm0, %v1081_v0 }
  0x2c   : > { %304 = vst.msk [vmem:[#allocation2 + $0x78] sm:$0xff] %vm288_vm0, %v1081_v0 }
  0x2d   : > { %305 = vst [vmem:[#allocation3] sm:$0x1] %v1081_v0 }
  0x2e   : > { %307 = vst.msk [vmem:[#allocation4] sm:$0x1] %vm306_vm1, %v1081_v0 }
  0x2f   : > { %308 = vst.msk [vmem:[#allocation5] sm:$0x1] %vm306_vm1, %v1081_v0 }
  0x30   : > { %309 = vst.msk [vmem:[#allocation6] sm:$0x1] %vm306_vm1, %v1081_v0 }
  0x31   : > { %310 = vst.msk [vmem:[#allocation7] sm:$0x1] %vm306_vm1, %v1081_v0 }
  0x32 PF: > { %v315_v1 = vld [vmem:[#allocation9 + $0x18] sm:$0xff]  ;;  %v314_v2 = vld [vmem:[#allocation9 + $0x10] sm:$0xff]  ;;  %v1082_v4 = vmov 0   ;;  %v313_v6 = vld [vmem:[#allocation9 + $0x8] sm:$0xff]  ;;  %vm347_vm2 = vcmask 261120   ;;  %s326_s20 = sld [smem:[#allocation13]]  ;;  %v318_v10 = vlaneseq }
  0x33   : > { %363 = vmatpush.msra.mxu0 %v315_v1  ;;  %v311_v3 = vld [vmem:[%s1164_s16] sm:$0xff]  ;;  %971 = vset.pattern.permute.xlu1 %v1082_v4  ;;  %s891_s21 = sld [smem:[#allocation13 + $0x1]]  ;;  %s889_s22 = sshll.u32 %s1132_s27, 3  ;;  %v1083_v14 = vmov 0.0   ;;  %vm504_vm9 = vcmask 64512   ;;  %v457_v63 = vld [vmem:[#allocation2 + $0x8] sm:$0xff] }
  0x34   : > { %v317_v5 = vld [vmem:[%s1169_s19] sm:$0xff]  ;;  %915 = vmatpush.msra.mxu1 %v311_v3  ;;  %916 = vmatpush.msra.mxu2 %v311_v3  ;;  %v319_v11 = vshrl.u32 %v318_v10, 7  ;;  %v321_v12 = vstv %s889_s22  ;;  %v337_v18 = vand.u32 127, %v318_v10  ;;  %vm391_vm10 = vcmask 7168   ;;  %p910_p8 = scmp.ne.s32.totalorder %s1132_s27, 1 }
  0x35   : > { %339 = vperm.xlu1 %971, %v317_v5   ;;  %364 = vmatpush.msra.mxu0 %v314_v2  ;;  %v312_v7 = vld [vmem:[#allocation9] sm:$0xff]  ;;  %v973_v21 = vld [vmem:[%s1277_s2] ss:$0 sm:$0xff]  ;;  %v458_v2 = vld [vmem:[#allocation2 + $0x10] sm:$0xff]  ;;  %vm404_vm11 = vcmask 0   ;;  %s788_s7 = sld [smem:[#allocation8]] (!%p910_p8) }
  0x36   : > { %917 = vmatpush.msra.mxu3 %v311_v3  ;;  %972 = vset.pattern.permute.xlu0 %v1082_v4  ;;  %v322_v13 = vadd.s32 %v321_v12, %v319_v11  ;;  %vm371_vm8 = vcmp.lt.s32.totalorder %v337_v18, 8  ;;  %v650_v40 = vld [vmem:[#allocation3] sm:$0x1] }
  0x37   : > { %365 = vmatpush.msra.mxu0 %v313_v6  ;;  %v456_v56 = vld [vmem:[#allocation2] sm:$0xff] }
  0x38   : > { %v327_v8 = vstv %s326_s20  ;;  %vm323_vm6 = vcmp.lt.s32.totalorder %v322_v13, 16 }
  0x39   : > { %366 = vmatpush.msra.mxu0 %v312_v7  ;;  %v330_v9 = vstv %s891_s21  ;;  %vm328_vm3 = vcmp.eq.s32.totalorder %v317_v5, %v327_v8  ;;  %v1193_v16 = vsel %vm323_vm6, 1.0, %v1083_v14 }
  0x3a   : > { %893 = vmatmul.msk.f32.vlgmr.msra.gmra.mxu0 %vm347_vm2, %v311_v3  ;;  %vm331_vm4 = vcmp.eq.s32.totalorder %v317_v5, %v330_v9  ;;  %v459_v5 = vld [vmem:[#allocation2 + $0x18] sm:$0xff]  ;;  %v460_v9 = vld [vmem:[#allocation2 + $0x20] sm:$0xff] }
  0x3b   : > { %568 = vmatpush.msrb.mxu0 %v311_v3  ;;  %vm332_vm5 = vmor %vm328_vm3, %vm331_vm4 }
  0x3c   : > { %v333_v15 = vsel %vm332_vm5, 1.0, %v1083_v14 }
  0x3d   : > { %v1196_v17 = vmul.f32 %v1193_v16, %v333_v15 }
  0x3f   : > { %452 = vperm.xlu1 %971, %v1196_v17  }
  0xa7   : > { %v340_v19 = vpop.permute.xlu1 %339 }
  0xa8   : > { %vm341_vm7 = vcmp.eq.s32.totalorder %v337_v18, %v340_v19  ;;  %v461_v19 = vld [vmem:[#allocation2 + $0x28] sm:$0xff] }
  0xa9   : > { %v892_v20 = vsel %vm341_vm7, 1.0, %v1083_v14  ;;  %v335_v14 = vsub.f32 %v1193_v16, %v1196_v17 }
  0xb1   : > { %v453_v33 = vpop.permute.xlu1 %452 }
  0xb7   : > { %v368_v22 = vpop.f32.mrf.mxu0 }
  0xb8   : > { %v369_v23 = vadd.f32 %v973_v21, %v368_v22 }
  0xba   : > { %v372_v24 = vsel %vm371_vm8, %v369_v23, -1e+30 }
  0xbb   : > { %373 = vmax.xlane.f32.xlu0 %v372_v24  ;;  %v382_v49 = vmul.f32 %v892_v20, %v372_v24 }
 0x12e   : > { %v1202_v25 = vpop.xlane.xlu0 %373 }
 0x12f   : > { %v375_v26 = vsub.f32 %v372_v24, %v1202_v25 }
 0x131   : > { %v376_v27 = vmul.f32 1.442695, %v375_v26 }
 0x133   : > { %974 = vpow2.f32 %v376_v27  ;;  %v422_v27 = vsel %vm391_vm10, %v335_v14, 0.0 }
 0x139   : > { %v975_v28 = vpop.eup %974 }
 0x13a   : > { %378 = vadd.xlane.f32.xlu0 %v975_v28 }
 0x1ad   : > { %v1205_v29 = vpop.xlane.xlu0 %378 }
 0x1ae   : > { %976 = vrcp.f32 %v1205_v29 }
 0x1af   : > { %978 = vlog2.f32 %v1205_v29  ;;  %v436_v29 = vsel %vm391_vm10, %v1196_v17, 0.0 }
 0x1b4   : > { %v977_v30 = vpop.eup %976 }
 0x1b5   : > { %v381_v31 = vmul.f32 %v977_v30, %v975_v28  ;;  %v979_v8 = vpop.eup %978  ;;  %v463_v30 = vld [vmem:[#allocation2 + $0x38] sm:$0xff] }
 0x1b6   : > { %v386_v10 = vmul.f32 0.6931472, %v979_v8 }
 0x1b7   : > { %v449_v32 = vsub.f32 %v381_v31, %v892_v20 }
 0x1b8   : > { %v387_v13 = vadd.f32 %v386_v10, %v1202_v25  ;;  %v462_v25 = vld [vmem:[#allocation2 + $0x30] sm:$0xff] }
 0x1b9   : > { %v455_v34 = vmul.f32 %v453_v33, %v449_v32  ;;  %v464_v33 = vld [vmem:[#allocation2 + $0x40] sm:$0xff] }
 0x1bb   : > { %v651_v35 = vrot.slane %v455_v34, 4  ;;  %472 = vxpose.xlu2.b32.start.end [1/1] (short) %v455_v34, 128 }
 0x1bd   : > { %v652_v36 = vadd.f32 %v651_v35, %v455_v34 }
 0x1bf   : > { %v653_v37 = vrot.slane %v652_v36, 2 }
 0x1c1   : > { %v654_v38 = vadd.f32 %v653_v37, %v652_v36  ;;  %v465_v36 = vld [vmem:[#allocation2 + $0x48] sm:$0xff] }
 0x1c3   : > { %v655_v39 = vrot.slane %v654_v38, 1 }
 0x1c5   : > { %v656_v41 = vadd.f32 %v655_v39, %v654_v38  ;;  %v466_v39 = vld [vmem:[#allocation2 + $0x50] sm:$0xff] }
 0x1c7   : > { %v657_v42 = vadd.f32 %v656_v41, %v650_v40  ;;  %v467_v41 = vld [vmem:[#allocation2 + $0x58] sm:$0xff] }
 0x1c9   : > { %658 = vst [vmem:[#allocation3] sm:$0x1] %v657_v42 }
 0x254   : > { %v488_v43 = vpop.trf.xlu2 }
 0x255   : > { %894 = vmatmul.msk.f32.vlgmr.msrb.gmra.mxu0 %vm504_vm9, %v488_v43 }
 0x25c   : > { %v489_v44 = vpop.trf.xlu2 }
 0x25d   : > { %895 = vmatmul.msk.f32.vlgmr.msra.gmra.mxu1 %vm504_vm9, %v489_v44  ;;  %v468_v44 = vld [vmem:[#allocation2 + $0x60] sm:$0xff] }
 0x264   : > { %v490_v45 = vpop.trf.xlu2 }
 0x265   : > { %896 = vmatmul.msk.f32.gmra.mxu1 %vm504_vm9, %v490_v45 }
 0x26c   : > { %v491_v46 = vpop.trf.xlu2 }
 0x26d   : > { %897 = vmatmul.msk.f32.gmra.mxu1 %vm504_vm9, %v491_v46 }
 0x274   : > { %v492_v47 = vpop.trf.xlu2 }
 0x275   : > { %898 = vmatmul.msk.f32.gmra.mxu1 %vm504_vm9, %v492_v47  ;;  %v469_v47 = vld [vmem:[#allocation2 + $0x68] sm:$0xff] }
 0x27c   : > { %v493_v48 = vpop.trf.xlu2 }
 0x27d   : > { %899 = vmatmul.msk.f32.gmra.mxu1 %vm504_vm9, %v493_v48 }
 0x284   : > { %v494_v50 = vpop.trf.xlu2 }
 0x285   : > { %900 = vmatmul.msk.f32.vlgmr.msra.gmra.mxu2 %vm504_vm9, %v494_v50  ;;  %v470_v50 = vld [vmem:[#allocation2 + $0x70] sm:$0xff] }
 0x28c   : > { %v495_v51 = vpop.trf.xlu2 }
 0x28d   : > { %901 = vmatmul.msk.f32.gmra.mxu2 %vm504_vm9, %v495_v51 }
 0x294   : > { %v496_v52 = vpop.trf.xlu2 }
 0x295   : > { %902 = vmatmul.msk.f32.gmra.mxu2 %vm504_vm9, %v496_v52 }
 0x29c   : > { %v497_v53 = vpop.trf.xlu2 }
 0x29d   : > { %903 = vmatmul.msk.f32.gmra.mxu2 %vm504_vm9, %v497_v53  ;;  %v471_v53 = vld [vmem:[#allocation2 + $0x78] sm:$0xff] }
 0x2a4   : > { %383 = vadd.xlane.f32.xlu2 %v382_v49  ;;  %v498_v54 = vpop.trf.xlu2 }
 0x2a5   : > { %904 = vmatmul.msk.f32.gmra.mxu2 %vm504_vm9, %v498_v54 }
 0x2ac   : > { %v499_v55 = vpop.trf.xlu2 }
 0x2ad   : > { %905 = vmatmul.msk.f32.vlgmr.msra.gmra.mxu3 %vm504_vm9, %v499_v55 }
 0x2b4   : > { %v500_v59 = vpop.trf.xlu2 }
 0x2b5   : > { %906 = vmatmul.msk.f32.gmra.mxu3 %vm504_vm9, %v500_v59 }
 0x2bc   : > { %v501_v60 = vpop.trf.xlu2 }
 0x2bd   : > { %907 = vmatmul.msk.f32.gmra.mxu3 %vm504_vm9, %v501_v60 }
 0x2c4   : > { %v502_v61 = vpop.trf.xlu2 }
 0x2c5   : > { %908 = vmatmul.msk.f32.gmra.mxu3 %vm504_vm9, %v502_v61 }
 0x2cc   : > { %v503_v62 = vpop.trf.xlu2 }
 0x2cd   : > { %909 = vmatmul.msk.f32.gmra.mxu3 %vm504_vm9, %v503_v62 }
 0x2d2   : > { %v570_v57 = vpop.f32.mrf.mxu0 }
 0x2d3   : > { %v618_v58 = vadd.f32 %v570_v57, %v456_v56 }
 0x2d5   : > { %634 = vst.msk [vmem:[#allocation2] sm:$0xff] %vm347_vm2, %v618_v58 }
 0x2da   : > { %v573_v0 = vpop.f32.mrf.mxu1 }
 0x2db   : > { %v619_v1 = vadd.f32 %v573_v0, %v457_v63 }
 0x2dd   : > { %635 = vst.msk [vmem:[#allocation2 + $0x8] sm:$0xff] %vm347_vm2, %v619_v1 }
 0x2e2   : > { %v576_v3 = vpop.f32.mrf.mxu1 }
 0x2e3   : > { %v620_v4 = vadd.f32 %v576_v3, %v458_v2 }
 0x2e5   : > { %636 = vst.msk [vmem:[#allocation2 + $0x10] sm:$0xff] %vm347_vm2, %v620_v4 }
 0x2ea   : > { %v579_v6 = vpop.f32.mrf.mxu1 }
 0x2eb   : > { %v621_v7 = vadd.f32 %v579_v6, %v459_v5 }
 0x2ed   : > { %637 = vst.msk [vmem:[#allocation2 + $0x18] sm:$0xff] %vm347_vm2, %v621_v7 }
 0x2f2   : > { %v582_v11 = vpop.f32.mrf.mxu1 }
 0x2f3   : > { %v622_v12 = vadd.f32 %v582_v11, %v460_v9 }
 0x2f5   : > { %638 = vst.msk [vmem:[#allocation2 + $0x20] sm:$0xff] %vm347_vm2, %v622_v12 }
 0x2fa   : > { %v585_v22 = vpop.f32.mrf.mxu1 }
 0x2fb   : > { %v623_v23 = vadd.f32 %v585_v22, %v461_v19  ;;  %v389_v22 = vld [vmem:[#allocation4] sm:$0x1] }
 0x2fd   : > { %639 = vst.msk [vmem:[#allocation2 + $0x28] sm:$0xff] %vm347_vm2, %v623_v23  ;;  %v406_v23 = vld [vmem:[#allocation5] sm:$0x1] }
 0x308   : > { %v588_v28 = vpop.f32.mrf.mxu2 }
 0x309   : > { %v624_v16 = vadd.f32 %v588_v28, %v462_v25  ;;  %v421_v28 = vld [vmem:[#allocation6] sm:$0x1] }
 0x30b   : > { %640 = vst.msk [vmem:[#allocation2 + $0x30] sm:$0xff] %vm347_vm2, %v624_v16 }
 0x310   : > { %v591_v31 = vpop.f32.mrf.mxu2 }
 0x311   : > { %v625_v32 = vadd.f32 %v591_v31, %v463_v30  ;;  %v435_v30 = vld [vmem:[#allocation7] sm:$0x1] }
 0x313   : > { %641 = vst.msk [vmem:[#allocation2 + $0x38] sm:$0xff] %vm347_vm2, %v625_v32 }
 0x317   : > { %v384_v15 = vpop.xlane.xlu2 %383 }
 0x318   : > { %v388_v18 = vsub.f32 %v387_v13, %v384_v15  ;;  %v594_v34 = vpop.f32.mrf.mxu2 }
 0x319   : > { %v626_v35 = vadd.f32 %v594_v34, %v464_v33 }
 0x31a   : > { %v407_v20 = vmul.f32 %v388_v18, %v1196_v17  ;;  %v390_v21 = vmul.f32 %v388_v18, %v335_v14 }
 0x31b   : > { %642 = vst.msk [vmem:[#allocation2 + $0x40] sm:$0xff] %vm347_vm2, %v626_v35 }
 0x31c   : > { %v408_v24 = vsel %vm391_vm10, %v407_v20, 0.0  ;;  %v392_v26 = vsel %vm391_vm10, %v390_v21, 0.0 }
 0x31d   : > { %409 = vadd.xlane.f32.xlu1 %v408_v24  ;;  %393 = vadd.xlane.f32.xlu0 %v392_v26 }
 0x320   : > { %v597_v37 = vpop.f32.mrf.mxu2 }
 0x321   : > { %v627_v38 = vadd.f32 %v597_v37, %v465_v36 }
 0x323   : > { %643 = vst.msk [vmem:[#allocation2 + $0x48] sm:$0xff] %vm347_vm2, %v627_v38 }
 0x325   : > { %423 = vadd.xlane.f32.xlu0 %v422_v27 }
 0x328   : > { %v600_v17 = vpop.f32.mrf.mxu2 }
 0x329   : > { %v628_v40 = vadd.f32 %v600_v17, %v466_v39 }
 0x32b   : > { %644 = vst.msk [vmem:[#allocation2 + $0x50] sm:$0xff] %vm347_vm2, %v628_v40 }
 0x32d   : > { %437 = vadd.xlane.f32.xlu0 %v436_v29 }
 0x330   : > { %v603_v42 = vpop.f32.mrf.mxu3 }
 0x331   : > { %v629_v43 = vadd.f32 %v603_v42, %v467_v41 }
 0x333   : > { %645 = vst.msk [vmem:[#allocation2 + $0x58] sm:$0xff] %vm347_vm2, %v629_v43 }
 0x338   : > { %v606_v45 = vpop.f32.mrf.mxu3 }
 0x339   : > { %v630_v46 = vadd.f32 %v606_v45, %v468_v44 }
 0x33b   : > { %646 = vst.msk [vmem:[#allocation2 + $0x60] sm:$0xff] %vm347_vm2, %v630_v46 }
 0x340   : > { %v609_v48 = vpop.f32.mrf.mxu3 }
 0x341   : > { %v631_v49 = vadd.f32 %v609_v48, %v469_v47 }
 0x343   : > { %647 = vst.msk [vmem:[#allocation2 + $0x68] sm:$0xff] %vm347_vm2, %v631_v49 }
 0x348   : > { %v612_v51 = vpop.f32.mrf.mxu3 }
 0x349   : > { %v632_v52 = vadd.f32 %v612_v51, %v470_v50 }
 0x34b   : > { %648 = vst.msk [vmem:[#allocation2 + $0x70] sm:$0xff] %vm347_vm2, %v632_v52 }
 0x350   : > { %v615_v54 = vpop.f32.mrf.mxu3 }
 0x351   : > { %v633_v55 = vadd.f32 %v615_v54, %v471_v53 }
 0x353   : > { %649 = vst.msk [vmem:[#allocation2 + $0x78] sm:$0xff] %vm347_vm2, %v633_v55 }
 0x390   : > { %v410_v56 = vpop.xlane.xlu1 %409  ;;  %v394_v57 = vpop.xlane.xlu0 %393 }
 0x391   : > { %v411_v58 = vrot.slane %v410_v56, 4  ;;  %v395_v59 = vrot.slane %v394_v57, 4 }
 0x393   : > { %v412_v60 = vadd.f32 %v411_v58, %v410_v56  ;;  %v396_v61 = vadd.f32 %v395_v59, %v394_v57 }
 0x395   : > { %v413_v62 = vrot.slane %v412_v60, 2  ;;  %v397_v63 = vrot.slane %v396_v61, 2 }
 0x397   : > { %v414_v0 = vadd.f32 %v413_v62, %v412_v60  ;;  %v398_v1 = vadd.f32 %v397_v63, %v396_v61 }
 0x398   : > { %v424_v2 = vpop.xlane.xlu0 %423 }
 0x399   : > { %v425_v3 = vrot.slane %v424_v2, 4  ;;  %v399_v4 = vrot.slane %v398_v1, 1  ;;  %v415_v5 = vrot.slane %v414_v0, 1 }
 0x39b   : > { %v426_v6 = vadd.f32 %v425_v3, %v424_v2  ;;  %v400_v7 = vadd.f32 %v399_v4, %v398_v1  ;;  %v416_v8 = vadd.f32 %v415_v5, %v414_v0 }
 0x39d   : > { %v427_v9 = vrot.slane %v426_v6, 2  ;;  %918 = vpush %v400_v7 }
 0x39e   : > { %920 = vpush %v416_v8 }
 0x39f   : > { %v428_v10 = vadd.f32 %v427_v9, %v426_v6 }
 0x3a0   : > { %v438_v11 = vpop.xlane.xlu0 %437 }
 0x3a1   : > { %v439_v12 = vrot.slane %v438_v11, 4  ;;  %v429_v13 = vrot.slane %v428_v10, 1 }
 0x3a3   : > { %v440_v14 = vadd.f32 %v439_v12, %v438_v11  ;;  %v430_v15 = vadd.f32 %v429_v13, %v428_v10 }
 0x3a5   : > { %v441_v18 = vrot.slane %v440_v14, 2  ;;  %922 = vpush %v430_v15 }
 0x3a7   : > { %v442_v19 = vadd.f32 %v441_v18, %v440_v14 }
 0x3a9   : > { %v443_v20 = vrot.slane %v442_v19, 1 }
 0x3ab   : > { %v444_v21 = vadd.f32 %v443_v20, %v442_v19 }
 0x3ad   : > { %924 = vpush %v444_v21 }
 0x3ce   : > { %s919_s26 = spop %918 }
 0x3cf   : > { %v402_v24 = vstv %s919_s26  ;;  %s921_s5 = spop %920 }
 0x3d0   : > { %v403_v26 = vadd.f32 %v402_v24, %v389_v22  ;;  %v418_v27 = vstv %s921_s5 }
 0x3d1   : > { %v419_v25 = vadd.f32 %v418_v27, %v406_v23 }
 0x3d2   : > { %405 = vst.msk [vmem:[#allocation4] sm:$0x1] %vm404_vm11, %v403_v26 }
 0x3d3   : > { %420 = vst.msk [vmem:[#allocation5] sm:$0x1] %vm404_vm11, %v419_v25 }
 0x3d6   : > { %s923_s28 = spop %922 }
 0x3d7   : > { %v432_v16 = vstv %s923_s28 }
 0x3d8   : > { %v433_v29 = vadd.f32 %v432_v16, %v421_v28 }
 0x3da   : > { %434 = vst.msk [vmem:[#allocation6] sm:$0x1] %vm404_vm11, %v433_v29 }
 0x3de   : > { %s925_s29 = spop %924  ;;  %662 = sbr.rel (%p910_p8) target bundleno = 1229 (0x4cd), region = 60 }
 0x3df   : > { %v446_v31 = vstv %s925_s29 }
 0x3e0   : > { %v447_v32 = vadd.f32 %v446_v31, %v435_v30 }
 0x3e2   : > { %448 = vst.msk [vmem:[#allocation7] sm:$0x1] %vm404_vm11, %v447_v32 }
 0x3e3   : > { %v699_v33 = vld [vmem:[#allocation2] sm:$0xff]  ;;  %v700_v34 = vld [vmem:[#allocation2 + $0x8] sm:$0xff]  ;;  %v701_v35 = vld [vmem:[#allocation2 + $0x10] sm:$0xff]  ;;  %vm773_vm12 = vcmask 1040384  }
 0x3e4   : > { %v702_v36 = vld [vmem:[#allocation2 + $0x18] sm:$0xff]  ;;  %v703_v37 = vld [vmem:[#allocation2 + $0x20] sm:$0xff]  ;;  %v715_v38 = vmul.f32 %v699_v33, %v699_v33  ;;  %v716_v39 = vmul.f32 %v700_v34, %v700_v34  ;;  %v717_v17 = vmul.f32 %v701_v35, %v701_v35  ;;  %v704_v41 = vld [vmem:[#allocation2 + $0x28] sm:$0xff] }
 0x3e5   : > { %v718_v40 = vmul.f32 %v702_v36, %v702_v36  ;;  %v719_v43 = vmul.f32 %v703_v37, %v703_v37  ;;  %v705_v45 = vld [vmem:[#allocation2 + $0x30] sm:$0xff]  ;;  %v720_v47 = vmul.f32 %v704_v41, %v704_v41  ;;  %v706_v50 = vld [vmem:[#allocation2 + $0x38] sm:$0xff]  ;;  %v707_v54 = vld [vmem:[#allocation2 + $0x40] sm:$0xff] }
 0x3e6   : > { %v731_v42 = vsel %vm347_vm2, %v715_v38, 0.0  ;;  %v732_v44 = vsel %vm347_vm2, %v716_v39, 0.0  ;;  %v734_v48 = vsel %vm347_vm2, %v717_v17, 0.0  ;;  %v721_v52 = vmul.f32 %v705_v45, %v705_v45  ;;  %v708_v58 = vld [vmem:[#allocation2 + $0x48] sm:$0xff]  ;;  %v709_v62 = vld [vmem:[#allocation2 + $0x50] sm:$0xff]  ;;  %v710_v2 = vld [vmem:[#allocation2 + $0x58] sm:$0xff] }
 0x3e7   : > { %v733_v46 = vadd.f32 %v732_v44, %v731_v42  ;;  %v736_v49 = vsel %vm347_vm2, %v718_v40, 0.0  ;;  %v738_v53 = vsel %vm347_vm2, %v719_v43, 0.0  ;;  %v722_v56 = vmul.f32 %v706_v50, %v706_v50  ;;  %v711_v6 = vld [vmem:[#allocation2 + $0x60] sm:$0xff]  ;;  %v712_v10 = vld [vmem:[#allocation2 + $0x68] sm:$0xff]  ;;  %v713_v14 = vld [vmem:[#allocation2 + $0x70] sm:$0xff] }
 0x3e8   : > { %v740_v57 = vsel %vm347_vm2, %v720_v47, 0.0  ;;  %v723_v60 = vmul.f32 %v707_v54, %v707_v54  ;;  %v742_v61 = vsel %vm347_vm2, %v721_v52, 0.0  ;;  %v724_v0 = vmul.f32 %v708_v58, %v708_v58  ;;  %v714_v20 = vld [vmem:[#allocation2 + $0x78] sm:$0xff]  ;;  %v771_v32 = vld [vmem:[#allocation3] sm:$0x1] }
 0x3e9   : > { %v735_v51 = vadd.f32 %v734_v48, %v733_v46  ;;  %v744_v1 = vsel %vm347_vm2, %v722_v56, 0.0  ;;  %v725_v4 = vmul.f32 %v709_v62, %v709_v62  ;;  %v726_v8 = vmul.f32 %v710_v2, %v710_v2  ;;  %v679_v48 = vld [vmem:[#allocation7] sm:$0x1] }
 0x3ea   : > { %v746_v5 = vsel %vm347_vm2, %v723_v60, 0.0  ;;  %v748_v9 = vsel %vm347_vm2, %v724_v0, 0.0  ;;  %v727_v12 = vmul.f32 %v711_v6, %v711_v6  ;;  %v728_v18 = vmul.f32 %v712_v10, %v712_v10  ;;  %v695_v10 = vld [vmem:[#allocation4] sm:$0x1] }
 0x3eb   : > { %v737_v55 = vadd.f32 %v736_v49, %v735_v51  ;;  %v750_v13 = vsel %vm347_vm2, %v725_v4, 0.0  ;;  %v752_v19 = vsel %vm347_vm2, %v726_v8, 0.0  ;;  %v729_v22 = vmul.f32 %v713_v14, %v713_v14  ;;  %v663_v49 = vld [vmem:[#allocation6] sm:$0x1]  ;;  %v697_v4 = vld [vmem:[#allocation5] sm:$0x1] }
 0x3ec   : > { %v754_v23 = vsel %vm347_vm2, %v727_v12, 0.0  ;;  %v730_v26 = vmul.f32 %v714_v20, %v714_v20  ;;  %v756_v27 = vsel %vm347_vm2, %v728_v18, 0.0  ;;  %v772_v33 = vmul.f32 %v771_v32, %v771_v32 }
 0x3ed   : > { %v739_v59 = vadd.f32 %v738_v53, %v737_v55  ;;  %v758_v28 = vsel %vm347_vm2, %v729_v22, 0.0  ;;  %980 = vrcp.f32 %v679_v48  ;;  %vm685_vm13 = vweird.f32 %v679_v48 }
 0x3ee   : > { %v760_v29 = vsel %vm347_vm2, %v730_v26, 0.0  ;;  %v774_v34 = vsel %vm773_vm12, %v772_v33, 0.0  ;;  %982 = vrcp.f32 %v663_v49  ;;  %v689_v60 = vand.u32 2147483647, %v679_v48 }
 0x3ef   : > { %v741_v63 = vadd.f32 %v740_v57, %v739_v59  ;;  %v691_v57 = vand.u32 2147483648, %v679_v48  ;;  %vm669_vm0 = vweird.f32 %v663_v49  ;;  %v673_v0 = vand.u32 2147483647, %v663_v49 }
 0x3f0   : > { %vm690_vm2 = vcmp.eq.f32.partialorder %v689_v60, 8.507059e+37  ;;  %v790_v12 = vstv %s788_s7 }
 0x3f1   : > { %v743_v3 = vadd.f32 %v742_v61, %v741_v63  ;;  %v675_v61 = vand.u32 2147483648, %v663_v49  ;;  %v692_v62 = vor.u32 1.1754944e-38, %v691_v57  ;;  %vm674_vm4 = vcmp.eq.f32.partialorder %v673_v0, 8.507059e+37 }
 0x3f3   : > { %v745_v7 = vadd.f32 %v744_v1, %v743_v3  ;;  %v981_v50 = vpop.eup %980  ;;  %v676_v2 = vor.u32 1.1754944e-38, %v675_v61 }
 0x3f4   : > { %v681_v51 = vmul.f32 %v981_v50, %v679_v48  ;;  %v983_v52 = vpop.eup %982  ;;  %vm686_vm14 = vweird.f32 %v981_v50 }
 0x3f5   : > { %v747_v11 = vadd.f32 %v746_v5, %v745_v7  ;;  %v665_v53 = vmul.f32 %v983_v52, %v663_v49  ;;  %vm687_vm15 = vmor %vm685_vm13, %vm686_vm14  ;;  %vm670_vm1 = vweird.f32 %v983_v52 }
 0x3f6   : > { %v682_v54 = vsub.f32 1.0, %v681_v51  ;;  %vm671_vm3 = vmor %vm669_vm0, %vm670_vm1 }
 0x3f7   : > { %v749_v15 = vadd.f32 %v748_v9, %v747_v11  ;;  %v666_v55 = vsub.f32 1.0, %v665_v53 }
 0x3f8   : > { %v683_v56 = vmul.f32 %v981_v50, %v682_v54 }
 0x3f9   : > { %v751_v21 = vadd.f32 %v750_v13, %v749_v15  ;;  %v667_v58 = vmul.f32 %v983_v52, %v666_v55 }
 0x3fa   : > { %v684_v59 = vadd.f32 %v981_v50, %v683_v56 }
 0x3fb   : > { %v753_v24 = vadd.f32 %v752_v19, %v751_v21  ;;  %v668_v63 = vadd.f32 %v983_v52, %v667_v58 }
 0x3fc   : > { %v688_v1 = vsel %vm687_vm15, %v981_v50, %v684_v59 }
 0x3fd   : > { %v755_v25 = vadd.f32 %v754_v23, %v753_v24  ;;  %v693_v3 = vsel %vm690_vm2, %v692_v62, %v688_v1  ;;  %v672_v5 = vsel %vm671_vm3, %v983_v52, %v668_v63 }
 0x3fe   : > { %v698_v7 = vmul.f32 %v697_v4, %v693_v3  ;;  %v677_v9 = vsel %vm674_vm4, %v676_v2, %v672_v5 }
 0x3ff   : > { %v757_v16 = vadd.f32 %v756_v27, %v755_v25  ;;  %v696_v13 = vmul.f32 %v695_v10, %v677_v9 }
 0x401   : > { %v759_v30 = vadd.f32 %v758_v28, %v757_v16 }
 0x403   : > { %v761_v31 = vadd.f32 %v760_v29, %v759_v30 }
 0x405   : > { %762 = vadd.xlane.f32.xlu0 %v761_v31 }
 0x40d   : > { %775 = vadd.xlane.f32.xlu0 %v774_v34 }
 0x478   : > { %v763_v35 = vpop.xlane.xlu0 %762 }
 0x479   : > { %v764_v36 = vrot.slane %v763_v35, 4 }
 0x47b   : > { %v765_v37 = vadd.f32 %v764_v36, %v763_v35 }
 0x47d   : > { %v766_v38 = vrot.slane %v765_v37, 2 }
 0x47f   : > { %v767_v39 = vadd.f32 %v766_v38, %v765_v37 }
 0x480   : > { %v776_v17 = vpop.xlane.xlu0 %775 }
 0x481   : > { %v777_v40 = vrot.slane %v776_v17, 4  ;;  %v768_v41 = vrot.slane %v767_v39, 1 }
 0x483   : > { %v778_v42 = vadd.f32 %v777_v40, %v776_v17  ;;  %v769_v43 = vadd.f32 %v768_v41, %v767_v39 }
 0x485   : > { %v779_v44 = vrot.slane %v778_v42, 2  ;;  %926 = vpush %v769_v43 }
 0x487   : > { %v780_v45 = vadd.f32 %v779_v44, %v778_v42 }
 0x489   : > { %v781_v46 = vrot.slane %v780_v45, 1 }
 0x48b   : > { %v782_v47 = vadd.f32 %v781_v46, %v780_v45 }
 0x48d   : > { %928 = vpush %v782_v47 }
 0x4b6   : > { %s927_s30 = spop %926 }
 0x4be   : > { %s929_s8 = spop %928 }
 0x4bf   : > { %s784_s9 = sadd.f32 %s929_s8, %s927_s30 }
 0x4c1   : > { %v785_v6 = vstv %s784_s9 }
 0x4c2   : > { %v786_v8 = vmul.f32 %v785_v6, %v693_v3 }
 0x4c4   : > { %v787_v11 = vmul.f32 %v786_v8, %v693_v3 }
 0x4c6   : > { %v789_v14 = vsub.f32 %v787_v11, %v698_v7 }
 0x4c8   : > { %v791_v15 = vmul.f32 %v790_v12, %v789_v14 }
 0x4ca   : > { %v792_v18 = vadd.f32 %v791_v15, %v696_v13 }
 0x4cc   : > { %793 = vst.msk [vmem:[#allocation14] sm:$0x1] %vm404_vm11, %v792_v18 }
 0x4cd PF: > { %p953_p9 = scmp.eq.s32.totalorder %s1132_s27, 1  ;;  %s1084_s10 = smov [#allocation14]  }
 0x4ce   : > { %s800_s11 = sshll.u32 %s1084_s10, 4  ;;  %s802_s14 = sshll.u32 %s1281_s6, 4  ;;  %s801_s11 = int_to_ptr.vmem [resolvable:$true] %s800_s11  ;;  %s803_s14 = int_to_ptr.hbm [resolvable:$true] %s802_s14 }
 0x4cf   : > { %939 = dma.vmem_to_hbm [thread:$0]  (%p953_p9), %s801_s11, 16, %s803_s14, [#allocation11]  }
 0x4d0   : > { %1070 = dma.done.wait (%p953_p9), [#allocation11], 16  }
 0x4d1   : > { %1072 = vsyncadd (%p953_p9), [#allocation11], 4294967280 }
 0x4d2 PF: > { %s20_s23 = sadd.s32 1, %s1075_s23  }
 0x4d3   : > { %p17_p10 = scmp.ge.s32.totalorder %s20_s23, 4  }
 0x4d5   :  { %19 = sbr.rel (!%p17_p10) target bundleno = 5 (0x5), region = 92 }
 0x4da   :  { %816 = vsyncpa [#allocation10], 1 }
 0x4db   :  { %818 = vsyncpa [#allocation10 + $0x1], 1 }
 0x4dc   :  { %819 = vsyncpa [#allocation11], 1 }
 0x4dd   :  { %821 = vsyncpa [#allocation11 + $0x1], 1 }
 0x4de   :  { %822 = vsyncpa [#allocation12], 1 }
 0x4df   :  { %824 = vsyncpa [#allocation12 + $0x1], 1 }

</bundles_post_ra>
